<compile_context>
chip_gen: v5e
topology: v5e:2x2
jax: 0.10.0
libtpu: 0.0.40
codegen_flags: <defaults>
</compile_context>

<pallas_src>
import functools
import math

import jax
import jax.numpy as jnp
from jax.experimental import pallas as pl
from jax.experimental.pallas import tpu as pltpu


_VMEM = pl.BlockSpec(memory_space=pltpu.MemorySpace.VMEM)
_SQRT_HALF = 1.0 / math.sqrt(2.0)


def _ln(x, g, b, eps):
    # LayerNorm over the last axis (value-level helper, used inside kernels).
    mean = jnp.mean(x, axis=-1, keepdims=True)
    var = jnp.mean((x - mean) ** 2, axis=-1, keepdims=True)
    return (x - mean) * jax.lax.rsqrt(var + eps) * g + b


# ----------------------------------------------------------------------------
# Kernel 1: standalone LayerNorm (embedding output only; in-layer LNs are fused)
# ----------------------------------------------------------------------------
def _layernorm_kernel(x_ref, g_ref, b_ref, o_ref, *, eps):
    o_ref[...] = _ln(x_ref[...].astype(jnp.float32),
                     g_ref[...], b_ref[...], eps).astype(o_ref.dtype)


def layer_norm(x, gamma, beta, eps=1e-5):
    return pl.pallas_call(
        functools.partial(_layernorm_kernel, eps=eps),
        out_shape=jax.ShapeDtypeStruct(x.shape, x.dtype),
        in_specs=[_VMEM] * 3,
        out_specs=_VMEM,
    )(x, gamma, beta)


# ----------------------------------------------------------------------------
# Kernel 2: ONE fused transformer encoder layer
#   QKV (one matmul) -> per-head attention (static unroll) -> output proj
#   -> residual+LN -> FFN (w1 + exact-erf GELU + w2) -> residual+LN
# ----------------------------------------------------------------------------
def _encoder_layer_kernel(x_ref, wqkv_ref, bqkv_ref, wo_ref, bo_ref,
                          ln1_g_ref, ln1_b_ref, w1_ref, b1_ref,
                          w2_ref, b2_ref, ln2_g_ref, ln2_b_ref, bias_ref,
                          o_ref, *, batch, seq, heads, head_dim, eps):
    B, S, nH, dH = batch, seq, heads, head_dim
    H = nH * dH
    scale = 1.0 / math.sqrt(dH)

    x = x_ref[...].astype(jnp.float32)                       # (M, H)

    # Fused QKV projection: one MXU matmul instead of three.
    qkv = (jnp.dot(x, wqkv_ref[...], preferred_element_type=jnp.float32)
           + bqkv_ref[...])                                  # (M, 3H)
    bias = bias_ref[...]                                     # (B, 1, S) additive mask

    # Multi-head attention for all heads inside this single invocation.
    ctx_heads = []
    for h in range(nH):                                      # static unroll, nH small
        q = qkv[:, 0 * H + h * dH:0 * H + (h + 1) * dH].reshape(B, S, dH)
        k = qkv[:, 1 * H + h * dH:1 * H + (h + 1) * dH].reshape(B, S, dH)
        v = qkv[:, 2 * H + h * dH:2 * H + (h + 1) * dH].reshape(B, S, dH)
        s = jnp.einsum("bqd,bkd->bqk", q, k,
                       preferred_element_type=jnp.float32) * scale + bias
        s = s - jnp.max(s, axis=-1, keepdims=True)
        p = jnp.exp(s)
        p = p * pl.reciprocal(jnp.sum(p, axis=-1, keepdims=True), approx=True)
        ctx = jnp.einsum("bqk,bkd->bqd", p, v,
                         preferred_element_type=jnp.float32)
        ctx_heads.append(ctx.reshape(B * S, dH))
    ctx = jnp.concatenate(ctx_heads, axis=-1)                # (M, H)

    attn = (jnp.dot(ctx, wo_ref[...], preferred_element_type=jnp.float32)
            + bo_ref[...])
    x = _ln(attn + x, ln1_g_ref[...], ln1_b_ref[...], eps)   # residual fused into LN

    # Fused FFN: w1 -> exact-erf GELU (RoBERTa) -> w2, residual + LN.
    h1 = (jnp.dot(x, w1_ref[...], preferred_element_type=jnp.float32)
          + b1_ref[...])
    h1 = 0.5 * h1 * (1.0 + jax.lax.erf(h1 * _SQRT_HALF))
    ffn = (jnp.dot(h1, w2_ref[...], preferred_element_type=jnp.float32)
           + b2_ref[...])
    x = _ln(ffn + x, ln2_g_ref[...], ln2_b_ref[...], eps)

    o_ref[...] = x.astype(o_ref.dtype)


def encoder_layer(x, p, bias, *, heads, head_dim, eps=1e-5):
    M, H = x.shape
    B = bias.shape[0]
    S = M // B
    return pl.pallas_call(
        functools.partial(_encoder_layer_kernel, batch=B, seq=S,
                          heads=heads, head_dim=head_dim, eps=eps),
        out_shape=jax.ShapeDtypeStruct((M, H), x.dtype),
        in_specs=[_VMEM] * 14,
        out_specs=_VMEM,
    )(x, p["wqkv"], p["bqkv"], p["wo"], p["bo"],
      p["ln1_g"], p["ln1_b"], p["w1"], p["b1"],
      p["w2"], p["b2"], p["ln2_g"], p["ln2_b"], bias)


# ----------------------------------------------------------------------------
# Kernel 3: fused bidirectional LSTM (PyTorch gate order i,f,g,o) + classifier
#   Only lstm_output[:, -1, :] is ever consumed by the module, so:
#     * forward direction: hoisted input projection (one lane-dense matmul over
#       the whole sequence) + serial recurrence over S steps (hd -> 4*hd).
#     * backward direction: its hidden at the last position is its FIRST step
#       from zero initial state -> closed form from x[S-1] only (no recurrence,
#       W_hh_bwd is dead because it multiplies h0 == 0).
#   Classifier head Linear(2*hd -> num_labels) fused into the same kernel.
# ----------------------------------------------------------------------------
def _bilstm_classifier_kernel(x_ref, wihf_ref, wihb_ref, whhf_ref,
                              bf_ref, bb_ref, cls_w_ref, cls_b_ref,
                              o_ref, gx_ref, *, hidden):
    S, B, H = x_ref.shape
    hd = hidden
    G = 4 * hd

    x = x_ref[...].astype(jnp.float32)                                 # (S, B, H)

    # Hoisted forward-direction input projection: one lane-dense MXU matmul
    # over the whole sequence instead of S tiny matmuls inside the loop.
    gx = (jnp.dot(x.reshape(S * B, H), wihf_ref[...],
                  preferred_element_type=jnp.float32) + bf_ref[...])
    gx_ref[...] = gx.reshape(S, B, G)

    def step(t, carry):
        h_f, c_f = carry
        # Forward recurrence only: (B, hd) @ (hd, 4*hd).
        gates = (jnp.dot(h_f, whhf_ref[...], preferred_element_type=jnp.float32)
                 + gx_ref[t])                                          # (B, 4*hd)
        # Full-vreg EUP activations, then 128-lane-aligned slices (hd == 128).
        sig = jax.nn.sigmoid(gates)
        th = jnp.tanh(gates)
        i_f, f_f = sig[:, 0:hd], sig[:, hd:2 * hd]
        g_f, o_f = th[:, 2 * hd:3 * hd], sig[:, 3 * hd:4 * hd]
        c_f = f_f * c_f + i_f * g_f
        h_f = o_f * jnp.tanh(c_f)
        return h_f, c_f

    z = jnp.zeros((B, hd), jnp.float32)
    h_f_last, _ = jax.lax.fori_loop(0, S, step, (z, z), unroll=2)

    # Backward direction, closed form at position S-1 (its first step):
    #   gates_b = x[S-1] @ W_ih_bwd + (b_ih_bwd + b_hh_bwd);  c = i*g;  h = o*tanh(c)
    gates_b = (jnp.dot(x[S - 1], wihb_ref[...],
                       preferred_element_type=jnp.float32) + bb_ref[...])
    sig_b = jax.nn.sigmoid(gates_b)
    th_b = jnp.tanh(gates_b)
    c_b = sig_b[:, 0:hd] * th_b[:, 2 * hd:3 * hd]
    h_b_last = sig_b[:, 3 * hd:4 * hd] * jnp.tanh(c_b)

    # pooled == lstm_output[:, -1, :] = [fwd h at t=S-1, bwd h at pos S-1]
    pooled = jnp.concatenate([h_f_last, h_b_last], axis=-1)            # (B, 2*hd)
    # TODO(synk): nn.Dropout(0.3) on the pooled output is identity in eval mode.
    o_ref[...] = (jnp.dot(pooled, cls_w_ref[...],
                          preferred_element_type=jnp.float32)
                  + cls_b_ref[...]).astype(o_ref.dtype)


def bilstm_classifier(x_sbh, lstm_p, cls_w, cls_b, *, hidden, num_labels):
    S, B, _ = x_sbh.shape
    return pl.pallas_call(
        functools.partial(_bilstm_classifier_kernel, hidden=hidden),
        out_shape=jax.ShapeDtypeStruct((B, num_labels), x_sbh.dtype),
        in_specs=[_VMEM] * 8,
        out_specs=_VMEM,
        scratch_shapes=[pltpu.VMEM((S, B, 4 * hidden), jnp.float32)],
    )(x_sbh, lstm_p["wih_f"], lstm_p["wih_b"], lstm_p["whh_f"],
      lstm_p["b_f"], lstm_p["b_b"], cls_w, cls_b)


# ----------------------------------------------------------------------------
# Model glue (embedding gathers, mask bias, transposes, loss) — plain JAX
# ----------------------------------------------------------------------------
def roberta_encoder(params, input_ids, attention_mask, cfg):
    B, S = input_ids.shape
    H = cfg["hidden"]

    # RoBERTa-style position ids (pad_id offset), token type 0.
    mask_i = attention_mask.astype(jnp.int32)
    pos_ids = (jnp.cumsum(mask_i, axis=1) * mask_i + cfg["pad_id"]).astype(jnp.int32)
    emb = (params["word_emb"][input_ids]
           + params["pos_emb"][pos_ids]
           + params["type_emb"][jnp.zeros_like(input_ids)])
    x = layer_norm(emb.reshape(B * S, H), params["emb_ln_g"], params["emb_ln_b"])
    # TODO(synk): embedding/hidden dropouts are identity (inference mode).

    # Additive attention-mask bias, built ONCE as (B, 1, S); broadcast in-kernel.
    bias = ((1.0 - attention_mask.astype(jnp.float32)) * -1e9).reshape(B, 1, S)

    for layer in params["layers"]:
        x = encoder_layer(x, layer, bias,
                          heads=cfg["heads"], head_dim=cfg["head_dim"])
    return x.reshape(B, S, H)


def roberta_lstm_classifier(params, input_ids, attention_mask, labels=None, *, cfg):
    seq_out = roberta_encoder(params, input_ids, attention_mask, cfg)    # (B, S, H)
    x_sbh = jnp.transpose(seq_out, (1, 0, 2))                            # time-major
    logits = bilstm_classifier(x_sbh, params["lstm"],
                               params["cls_w"], params["cls_b"],
                               hidden=cfg["lstm_hidden"],
                               num_labels=cfg["num_labels"])             # (B, L)
    loss = None
    if labels is not None:
        logp = jax.nn.log_softmax(logits.astype(jnp.float32), axis=-1)
        loss = -jnp.mean(jnp.take_along_axis(logp, labels[:, None], axis=-1))
    return {"loss": loss, "logits": logits}


# ----------------------------------------------------------------------------
# Deterministic synthetic parameter init (fused weight layouts, PyTorch gate order)
# ----------------------------------------------------------------------------
def init_params(key, cfg):
    H, I, hd = cfg["hidden"], cfg["inter"], cfg["lstm_hidden"]
    keys = iter(jax.random.split(key, 256))

    def nrm(shape, std=0.02):
        return (std * jax.random.normal(next(keys), shape)).astype(jnp.float32)

    def unif(shape, bound):
        return jax.random.uniform(next(keys), shape, jnp.float32, -bound, bound)

    params = dict(
        word_emb=nrm((cfg["vocab"], H)),
        pos_emb=nrm((cfg["max_pos"] + 2, H)),
        type_emb=nrm((1, H)),
        emb_ln_g=jnp.ones((1, H), jnp.float32),
        emb_ln_b=jnp.zeros((1, H), jnp.float32),
        layers=[],
    )
    for _ in range(cfg["layers"]):
        params["layers"].append(dict(
            wqkv=nrm((H, 3 * H)), bqkv=jnp.zeros((1, 3 * H), jnp.float32),
            wo=nrm((H, H)), bo=jnp.zeros((1, H), jnp.float32),
            ln1_g=jnp.ones((1, H), jnp.float32), ln1_b=jnp.zeros((1, H), jnp.float32),
            w1=nrm((H, I)), b1=jnp.zeros((1, I), jnp.float32),
            w2=nrm((I, H)), b2=jnp.zeros((1, H), jnp.float32),
            ln2_g=jnp.ones((1, H), jnp.float32), ln2_b=jnp.zeros((1, H), jnp.float32),
        ))

    kb = 1.0 / math.sqrt(hd)
    # BiLSTM weights (gate order i,f,g,o within each direction):
    #   wih_f / wih_b : (H, 4*hd)     input projections
    #   whh_f         : (hd, 4*hd)    forward recurrent weight
    #   b_f / b_b     : (1, 4*hd)     b_ih + b_hh per direction
    # W_hh_bwd is omitted: it multiplies the backward direction's zero initial
    # hidden state at the only backward step that reaches the output, so it is
    # mathematically dead for this module's forward pass.
    params["lstm"] = dict(
        wih_f=unif((H, 4 * hd), kb),
        wih_b=unif((H, 4 * hd), kb),
        whh_f=unif((hd, 4 * hd), kb),
        b_f=unif((1, 4 * hd), kb) + unif((1, 4 * hd), kb),
        b_b=unif((1, 4 * hd), kb) + unif((1, 4 * hd), kb),
    )
    kc = 1.0 / math.sqrt(2 * hd)
    params["cls_w"] = unif((2 * hd, cfg["num_labels"]), kc)
    params["cls_b"] = unif((1, cfg["num_labels"]), kc)
    return params


if __name__ == "__main__":
    # Small, lane-dense synthetic RoBERTa config; lstm_hidden=128 matches the
    # PyTorch module's default lstm_hidden_dim.
    cfg = dict(vocab=100, hidden=128, heads=2, head_dim=64, inter=512,
               layers=2, max_pos=32, pad_id=1, lstm_hidden=128, num_labels=2)

    root = jax.random.PRNGKey(0)
    params = init_params(root, cfg)

    B, S = 2, 16
    input_ids = jax.random.randint(jax.random.fold_in(root, 1), (B, S),
                                   2, cfg["vocab"], dtype=jnp.int32)
    attention_mask = jnp.ones((B, S), jnp.int32)
    labels = jnp.array([0, 1], jnp.int32)

    out = roberta_lstm_classifier(params, input_ids, attention_mask, labels, cfg=cfg)
    jax.block_until_ready(out["logits"])
    jax.block_until_ready(out["loss"])
    assert out["logits"].shape == (B, cfg["num_labels"])
    print("KERNEL_OK")
</pallas_src>

<mosaic_0001>
module attributes {stable_mosaic.version = 11 : i64} {
  func.func @_layernorm_kernel(%arg0: memref<32x128xf32, #tpu.memory_space<vmem>>, %arg1: memref<1x128xf32, #tpu.memory_space<vmem>>, %arg2: memref<1x128xf32, #tpu.memory_space<vmem>>, %arg3: memref<32x128xf32, #tpu.memory_space<vmem>>) attributes {dimension_semantics = [], scalar_prefetch = 0 : i64, scratch_operands = 0 : i64, tpu.core_type = #tpu.core_type<tc>} {
    %c0 = arith.constant 0 : index
    %c0_0 = arith.constant 0 : index
    %0 = vector.load %arg0[%c0, %c0_0] : memref<32x128xf32, #tpu.memory_space<vmem>>, vector<32x128xf32>
    %c0_1 = arith.constant 0 : index
    %c0_2 = arith.constant 0 : index
    %1 = vector.load %arg1[%c0_1, %c0_2] : memref<1x128xf32, #tpu.memory_space<vmem>>, vector<1x128xf32>
    %c0_3 = arith.constant 0 : index
    %c0_4 = arith.constant 0 : index
    %2 = vector.load %arg2[%c0_3, %c0_4] : memref<1x128xf32, #tpu.memory_space<vmem>>, vector<1x128xf32>
    %cst = arith.constant dense<0.000000e+00> : vector<32xf32>
    %3 = vector.multi_reduction <add>, %0, %cst [1] : vector<32x128xf32> to vector<32xf32>
    %4 = vector.shape_cast %3 : vector<32xf32> to vector<32x1xf32>
    %cst_5 = arith.constant 1.280000e+02 : f32
    %5 = vector.broadcast %cst_5 : f32 to vector<32x1xf32>
    %6 = arith.divf %4, %5 : vector<32x1xf32>
    %7 = vector.broadcast %6 : vector<32x1xf32> to vector<32x128xf32>
    %8 = arith.subf %0, %7 : vector<32x128xf32>
    %9 = arith.mulf %8, %8 : vector<32x128xf32>
    %cst_6 = arith.constant dense<0.000000e+00> : vector<32xf32>
    %10 = vector.multi_reduction <add>, %9, %cst_6 [1] : vector<32x128xf32> to vector<32xf32>
    %11 = vector.shape_cast %10 : vector<32xf32> to vector<32x1xf32>
    %cst_7 = arith.constant 1.280000e+02 : f32
    %12 = vector.broadcast %cst_7 : f32 to vector<32x1xf32>
    %13 = arith.divf %11, %12 : vector<32x1xf32>
    %14 = vector.broadcast %6 : vector<32x1xf32> to vector<32x128xf32>
    %15 = arith.subf %0, %14 : vector<32x128xf32>
    %cst_8 = arith.constant 9.99999974E-6 : f32
    %16 = vector.broadcast %cst_8 : f32 to vector<32x1xf32>
    %17 = arith.addf %13, %16 : vector<32x1xf32>
    %18 = math.rsqrt %17 : vector<32x1xf32>
    %19 = vector.broadcast %18 : vector<32x1xf32> to vector<32x128xf32>
    %20 = arith.mulf %15, %19 : vector<32x128xf32>
    %21 = vector.broadcast %1 : vector<1x128xf32> to vector<32x128xf32>
    %22 = arith.mulf %20, %21 : vector<32x128xf32>
    %23 = vector.broadcast %2 : vector<1x128xf32> to vector<32x128xf32>
    %24 = arith.addf %22, %23 : vector<32x128xf32>
    %c0_9 = arith.constant 0 : index
    %c0_10 = arith.constant 0 : index
    %25 = vector.load %arg3[%c0_9, %c0_10] : memref<32x128xf32, #tpu.memory_space<vmem>>, vector<32x128xf32>
    tpu.vector_store %arg3[%c0_9, %c0_10], %24 {strides = array<i32>} : memref<32x128xf32, #tpu.memory_space<vmem>>, vector<32x128xf32>,
    return
  }
}

</mosaic_0001>

<bundles_post_ra>
// kernel: tpu_custom_call.1
= control target key start
LH: loop header
LB: loop body
LE: loop exit
PB: predicated region body
PF: predicated region fallthrough
CT: control target
= control target key end

     0   :  { %8 = vsyncpa [#allocation3], 0  ;;  %s326_s0 = inlined_call_operand.hbm [shape: f32[32,128], index: 0, kind: input, shape index: {}]   ;;  %s327_s1 = inlined_call_operand.hbm [shape: f32[1,128], index: 1, kind: input, shape index: {}]   ;;  %s328_s2 = inlined_call_operand.vmem [shape: f32[1,128], index: 2, kind: input, shape index: {}]   ;;  %s329_s3 = inlined_call_operand.hbm [shape: f32[32,128], index: 3, kind: output, shape index: {}]  }
   0x1   :  { %9 = vsyncpa [#allocation6], 0 }
   0x2   :  { %10 = vsyncpa [#allocation4], 0  ;;  %s15_s14 = sshll.u32 %s326_s0, 4  ;;  %s272_s15 = smov [#allocation2]   ;;  %s16_s14 = int_to_ptr.hbm [resolvable:$true] %s15_s14 }
   0x3   :  { %s17_s16 = sshll.u32 %s272_s15, 4  ;;  %s29_s19 = sshll.u32 %s327_s1, 4  ;;  %s18_s16 = int_to_ptr.vmem [resolvable:$true] %s17_s16  ;;  %s30_s19 = int_to_ptr.hbm [resolvable:$true] %s29_s19 }
   0x4   :  { %s273_s20 = smov 128   ;;  %s274_s21 = smov 8  }
   0x5   :  { %23 = dma.hbm_to_vmem [thread:$0]  %s16_s14, 512, %s18_s16, [#allocation3], %s273_s20, %s273_s20, %s274_s21  }
   0x6   :  { %s275_s22 = smov [#allocation5]  }
   0x7   :  { %s31_s23 = sshll.u32 %s275_s22, 4  ;;  %s32_s23 = int_to_ptr.vmem [resolvable:$true] %s31_s23 }
   0x8   :  { %34 = dma.hbm_to_vmem [thread:$0]  %s30_s19, 16, %s32_s23, [#allocation6]  }
   0x9   :  { %266 = dma.done.wait [#allocation3], 512  }
   0xa   :  { %267 = vsyncadd [#allocation3], 4294966784 }
   0xb   :  { %268 = dma.done.wait [#allocation6], 16  }
   0xc   :  { %269 = vsyncadd [#allocation6], 4294967280  ;;  %v47_v0 = vld [vmem:[#allocation2 + $0x10] sm:$0xff]  ;;  %v45_v1 = vld [vmem:[#allocation2] sm:$0xff]  ;;  %v276_v4 = vmov 128.0   ;;  %s162_s27 = sshll.u32 %s329_s3, 4  ;;  %s163_s27 = int_to_ptr.hbm [resolvable:$true] %s162_s27 }
   0xd   :  { %55 = vadd.xlane.f32.xlu1 %v47_v0  ;;  %51 = vadd.xlane.f32.xlu0 %v45_v1  ;;  %v48_v2 = vld [vmem:[#allocation2 + $0x18] sm:$0xff]  ;;  %v46_v3 = vld [vmem:[#allocation2 + $0x8] sm:$0xff]  ;;  %184 = vrcp.f32 %v276_v4  ;;  %v182_v53 = vld [vmem:[#allocation5] ss:$0 sm:$0xff] }
   0xe   :  { %v183_v61 = vld [vmem:[%s328_s2] ss:$0 sm:$0xff]  ;;  %s277_s2 = smov [#allocation7]  }
   0xf   :  { %s160_s24 = sshll.u32 %s277_s2, 4  ;;  %s161_s24 = int_to_ptr.vmem [resolvable:$true] %s160_s24 }
  0x13   :  { %v185_v5 = vpop.eup %184 }
  0x14   :  { %v60_v6 = vmul.f32 128.0, %v185_v5  ;;  %vm64_vm0 = vweird.f32 %v185_v5 }
  0x15   :  { %57 = vadd.xlane.f32.xlu1 %v48_v2  ;;  %53 = vadd.xlane.f32.xlu0 %v46_v3 }
  0x16   :  { %v61_v7 = vsub.f32 1.0, %v60_v6 }
  0x18   :  { %v62_v8 = vmul.f32 %v185_v5, %v61_v7 }
  0x1a   :  { %v63_v9 = vadd.f32 %v185_v5, %v62_v8 }
  0x1c   :  { %v65_v10 = vsel %vm64_vm0, %v185_v5, %v63_v9 }
  0x80   :  { %v56_v11 = vpop.xlane.xlu1 %55  ;;  %v52_v12 = vpop.xlane.xlu0 %51 }
  0x81   :  { %v68_v13 = vmul.f32 %v65_v10, %v56_v11  ;;  %v66_v14 = vmul.f32 %v65_v10, %v52_v12 }
  0x83   :  { %v72_v15 = vsub.f32 %v47_v0, %v68_v13  ;;  %v70_v16 = vsub.f32 %v45_v1, %v66_v14 }
  0x85   :  { %v76_v17 = vmul.f32 %v72_v15, %v72_v15  ;;  %v74_v18 = vmul.f32 %v70_v16, %v70_v16 }
  0x87   :  { %82 = vadd.xlane.f32.xlu0 %v76_v17  ;;  %78 = vadd.xlane.f32.xlu2 %v74_v18 }
  0x88   :  { %v58_v19 = vpop.xlane.xlu1 %57  ;;  %v54_v20 = vpop.xlane.xlu0 %53 }
  0x89   :  { %v69_v21 = vmul.f32 %v65_v10, %v58_v19  ;;  %v67_v22 = vmul.f32 %v65_v10, %v54_v20 }
  0x8b   :  { %v307_v23 = vsub.f32 %v48_v2, %v69_v21  ;;  %v309_v24 = vsub.f32 %v46_v3, %v67_v22 }
  0x8d   :  { %v77_v25 = vmul.f32 %v307_v23, %v307_v23  ;;  %v75_v26 = vmul.f32 %v309_v24, %v309_v24 }
  0x8f   :  { %84 = vadd.xlane.f32.xlu1 %v77_v25  ;;  %80 = vadd.xlane.f32.xlu2 %v75_v26 }
  0xfa   :  { %v79_v27 = vpop.xlane.xlu2 %78  ;;  %v83_v28 = vpop.xlane.xlu0 %82 }
  0xfb   :  { %v86_v29 = vmul.f32 %v79_v27, %v65_v10  ;;  %v88_v30 = vmul.f32 %v83_v28, %v65_v10 }
  0xfd   :  { %v90_v31 = vadd.f32 1e-05, %v86_v29  ;;  %v92_v32 = vadd.f32 1e-05, %v88_v30 }
  0xff   :  { %186 = vrsqrt.f32 %v90_v31  ;;  %vm100_vm3 = vweird.f32 %v90_v31  ;;  %vm120_vm5 = vweird.f32 %v92_v32 }
 0x100   :  { %188 = vrsqrt.f32 %v92_v32 }
 0x102   :  { %v85_v33 = vpop.xlane.xlu1 %84  ;;  %v81_v34 = vpop.xlane.xlu2 %80 }
 0x103   :  { %v89_v35 = vmul.f32 %v85_v33, %v65_v10  ;;  %v87_v36 = vmul.f32 %v81_v34, %v65_v10 }
 0x105   :  { %v187_v37 = vpop.eup %186  ;;  %v93_v38 = vadd.f32 1e-05, %v89_v35  ;;  %v91_v39 = vadd.f32 1e-05, %v87_v36 }
 0x106   :  { %v189_v40 = vpop.eup %188  ;;  %v95_v41 = vmul.f32 %v187_v37, %v90_v31  ;;  %vm101_vm1 = vweird.f32 %v187_v37 }
 0x107   :  { %v115_v42 = vmul.f32 %v189_v40, %v92_v32  ;;  %190 = vrsqrt.f32 %v93_v38  ;;  %vm121_vm2 = vweird.f32 %v189_v40  ;;  %vm102_vm4 = vmor %vm100_vm3, %vm101_vm1  ;;  %vm130_vm9 = vweird.f32 %v93_v38 }
 0x108   :  { %v96_v43 = vmul.f32 %v187_v37, %v95_v41  ;;  %192 = vrsqrt.f32 %v91_v39  ;;  %vm122_vm6 = vmor %vm120_vm5, %vm121_vm2  ;;  %vm110_vm11 = vweird.f32 %v91_v39 }
 0x109   :  { %v116_v44 = vmul.f32 %v189_v40, %v115_v42 }
 0x10a   :  { %v97_v45 = vmul.f32 0.5, %v96_v43 }
 0x10b   :  { %v117_v46 = vmul.f32 0.5, %v116_v44 }
 0x10c   :  { %v98_v47 = vsub.f32 1.5, %v97_v45 }
 0x10d   :  { %v191_v48 = vpop.eup %190  ;;  %v118_v49 = vsub.f32 1.5, %v117_v46 }
 0x10e   :  { %v193_v50 = vpop.eup %192  ;;  %v99_v51 = vmul.f32 %v187_v37, %v98_v47  ;;  %v125_v52 = vmul.f32 %v191_v48, %v93_v38  ;;  %vm131_vm7 = vweird.f32 %v191_v48 }
 0x10f   :  { %v119_v54 = vmul.f32 %v189_v40, %v118_v49  ;;  %v105_v55 = vmul.f32 %v193_v50, %v91_v39  ;;  %vm111_vm8 = vweird.f32 %v193_v50  ;;  %vm132_vm10 = vmor %vm130_vm9, %vm131_vm7 }
 0x110   :  { %v103_v56 = vsel %vm102_vm4, %v187_v37, %v99_v51  ;;  %v126_v57 = vmul.f32 %v191_v48, %v125_v52  ;;  %vm112_vm12 = vmor %vm110_vm11, %vm111_vm8 }
 0x111   :  { %v134_v58 = vmul.f32 %v103_v56, %v70_v16  ;;  %v123_v59 = vsel %vm122_vm6, %v189_v40, %v119_v54  ;;  %v106_v60 = vmul.f32 %v193_v50, %v105_v55 }
 0x112   :  { %v136_v62 = vmul.f32 %v123_v59, %v72_v15  ;;  %v127_v63 = vmul.f32 0.5, %v126_v57 }
 0x113   :  { %v141_v0 = vmul.f32 %v182_v53, %v134_v58  ;;  %v107_v1 = vmul.f32 0.5, %v106_v60 }
 0x114   :  { %v143_v2 = vmul.f32 %v182_v53, %v136_v62  ;;  %v128_v3 = vsub.f32 1.5, %v127_v63 }
 0x115   :  { %v108_v4 = vsub.f32 1.5, %v107_v1  ;;  %v148_v5 = vadd.f32 %v183_v61, %v141_v0 }
 0x116   :  { %v129_v6 = vmul.f32 %v191_v48, %v128_v3  ;;  %v150_v7 = vadd.f32 %v183_v61, %v143_v2 }
 0x117   :  { %v109_v8 = vmul.f32 %v193_v50, %v108_v4  ;;  %152 = vst [vmem:[#allocation7] sm:$0xff] %v148_v5 }
 0x118   :  { %v133_v9 = vsel %vm132_vm10, %v191_v48, %v129_v6  ;;  %154 = vst [vmem:[#allocation7 + $0x10] sm:$0xff] %v150_v7 }
 0x119   :  { %v137_v10 = vmul.f32 %v133_v9, %v307_v23  ;;  %v113_v11 = vsel %vm112_vm12, %v193_v50, %v109_v8 }
 0x11a   :  { %v135_v12 = vmul.f32 %v113_v11, %v309_v24 }
 0x11b   :  { %v144_v13 = vmul.f32 %v182_v53, %v137_v10 }
 0x11c   :  { %v142_v14 = vmul.f32 %v182_v53, %v135_v12 }
 0x11d   :  { %v151_v15 = vadd.f32 %v183_v61, %v144_v13 }
 0x11e   :  { %v149_v16 = vadd.f32 %v183_v61, %v142_v14 }
 0x11f   :  { %155 = vst [vmem:[#allocation7 + $0x18] sm:$0xff] %v151_v15 }
 0x120   :  { %153 = vst [vmem:[#allocation7 + $0x8] sm:$0xff] %v149_v16 }
 0x121   :  { %168 = dma.vmem_to_hbm [thread:$0]  %s161_s24, 512, %s163_s27, [#allocation4], %s273_s20, %s273_s20, %s274_s21  }
 0x122   :  { %270 = dma.done.wait [#allocation4], 512  }
 0x123   :  { %271 = vsyncadd [#allocation4], 4294966784 }
 0x124   :  { %173 = vsyncpa [#allocation3], 1 }
 0x125   :  { %174 = vsyncpa [#allocation6], 1 }
 0x126   :  { %175 = vsyncpa [#allocation4], 1 }

</bundles_post_ra>
